<compile_context>
chip_gen: v7x
topology: tpu7x:2x2x1
jax: 0.10.0
libtpu: 0.0.40
codegen_flags: <defaults>
</compile_context>

<pallas_src>
import jax
import jax.numpy as jnp
from jax import lax
from jax.experimental import pallas as pl
from jax.experimental.pallas import tpu as pltpu


_VMEM_LIMIT = 48 * 1024 * 1024  # below v7x's 64 MiB physical; above v5e's 16 MiB default


def _input_proj_kernel(x_ref, wih_ref, b_ref, gates_ref):
    # x_ref:     (bm, F)   bf16 row slab (rows = flattened (t, b))
    # wih_ref:   (F, 4H)   bf16 input->gate weights (pre-transposed, gate-permuted)
    # b_ref:     (1, 4H)   f32 combined bias (b_ih + b_hh), gate-permuted
    # gates_ref: (bm, 4H)  f32 output slab
    gates_ref[...] = (
        jnp.dot(x_ref[...], wih_ref[...], preferred_element_type=jnp.float32)
        + b_ref[...]
    )


def _lstm_recurrence_kernel(gates_ref, whh_ref, out_ref, h_ref, c_ref):
    # gates_ref: (Tc, Bb, 4H) f32  precomputed x@W_ih + b for this time chunk
    # whh_ref:   (H, 4H)      bf16 hidden->gate weights (resident across grid)
    # out_ref:   (Tc, Bb, H)  f32  hidden states for this chunk (VMEM, written
    #                              per step; flushed to HBM once per chunk by
    #                              the BlockSpec pipeline)
    # h_ref/c_ref: (Bb, H)    f32  persistent carries across time chunks
    tc_len = gates_ref.shape[0]
    H = whh_ref.shape[0]

    # New batch block starts a fresh sequence: zero the carries.
    @pl.when(pl.program_id(1) == 0)
    def _():
        h_ref[...] = jnp.zeros_like(h_ref)
        c_ref[...] = jnp.zeros_like(c_ref)

    def step(t, carry):
        h, c = carry
        # Recurrent dot: bf16 operands, f32 accumulate.
        g = gates_ref[t] + jnp.dot(
            h.astype(jnp.bfloat16), whh_ref[...],
            preferred_element_type=jnp.float32,
        )  # (Bb, 4H)
        # Gate columns are pre-permuted to (i, f, o, g): one sigmoid slab, one tanh.
        sig = jax.nn.sigmoid(g[:, : 3 * H])
        i_g = sig[:, 0 * H:1 * H]
        f_g = sig[:, 1 * H:2 * H]
        o_g = sig[:, 2 * H:3 * H]
        c_g = jnp.tanh(g[:, 3 * H:])
        c_new = f_g * c + i_g * c_g
        h_new = o_g * jnp.tanh(c_new)
        out_ref[t] = h_new.astype(out_ref.dtype)
        return (h_new, c_new)

    # Partial unroll: LLO cross-iteration scheduling without exploding vreg
    # pressure / compile time at realistic T.
    h_fin, c_fin = lax.fori_loop(
        0, tc_len, step, (h_ref[...], c_ref[...]), unroll=4)
    h_ref[...] = h_fin
    c_ref[...] = c_fin


def _permute_gate_columns(w, H):
    """PyTorch gate order (i, f, g, o) -> kernel order (i, f, o, g) along last dim."""
    i = w[..., 0 * H:1 * H]
    f = w[..., 1 * H:2 * H]
    g = w[..., 2 * H:3 * H]
    o = w[..., 3 * H:4 * H]
    return jnp.concatenate([i, f, o, g], axis=-1)


def dynrnn_forward(x, w_ih, w_hh, bias):
    """x: (B, T, F) float32. Weights in PyTorch (i,f,g,o) column order,
    pre-transposed to (F, 4H)/(H, 4H); bias (1, 4H) = b_ih + b_hh.
    Returns (-1, B) like the PyTorch module."""
    B, T, F = x.shape
    H4 = w_ih.shape[1]
    H = H4 // 4

    # --- Wrapper-side layout / dtype prep (pure plumbing, no compute hoisting). ---
    w_ih_p = _permute_gate_columns(w_ih, H).astype(jnp.bfloat16)
    w_hh_p = _permute_gate_columns(w_hh, H).astype(jnp.bfloat16)
    bias_p = _permute_gate_columns(bias, H)  # stays f32 (added to f32 gates)

    # Time-major 2-D slab for the projection GEMM: row = t*B + b.
    x2d = jnp.transpose(x, (1, 0, 2)).reshape(T * B, F).astype(jnp.bfloat16)

    # --- Kernel 1: input projection, one GEMM over all (T*B) rows. -------------
    M = T * B
    block_m = 256 if (M % 256 == 0) else M  # demo: whole slab in one block
    gates2d = pl.pallas_call(
        _input_proj_kernel,
        out_shape=jax.ShapeDtypeStruct((M, H4), jnp.float32),
        grid=(pl.cdiv(M, block_m),),
        in_specs=[
            pl.BlockSpec((block_m, F), lambda i: (i, 0)),
            pl.BlockSpec((F, H4), lambda i: (0, 0)),
            pl.BlockSpec((1, H4), lambda i: (0, 0)),
        ],
        out_specs=pl.BlockSpec((block_m, H4), lambda i: (i, 0)),
        compiler_params=pltpu.CompilerParams(
            dimension_semantics=("parallel",),
            vmem_limit_bytes=_VMEM_LIMIT,
        ),
    )(x2d, w_ih_p, bias_p)
    gates = gates2d.reshape(T, B, H4)  # time-major (T, B, 4H) view

    # --- Kernel 2: serial recurrence, streamed over time chunks. ---------------
    # Demo: whole (tiny) batch in one block.  At realistic B pick block_b of
    # 128/256 and (on v7x) >= 2 batch blocks so the parallel axis feeds both TCs.
    block_b = B
    t_chunk = 4 if (T % 4 == 0) else T
    n_b = pl.cdiv(B, block_b)
    n_t = T // t_chunk

    out = pl.pallas_call(
        _lstm_recurrence_kernel,
        out_shape=jax.ShapeDtypeStruct((T, B, H), jnp.float32),
        grid=(n_b, n_t),  # batch blocks (parallel), time chunks last (arbitrary)
        in_specs=[
            pl.BlockSpec((t_chunk, block_b, H4), lambda bi, tc: (tc, bi, 0)),
            pl.BlockSpec((H, H4), lambda bi, tc: (0, 0)),
        ],
        out_specs=pl.BlockSpec((t_chunk, block_b, H), lambda bi, tc: (tc, bi, 0)),
        scratch_shapes=[
            pltpu.VMEM((block_b, H), jnp.float32),  # h carry (persists over chunks)
            pltpu.VMEM((block_b, H), jnp.float32),  # c carry
        ],
        compiler_params=pltpu.CompilerParams(
            dimension_semantics=("parallel", "arbitrary"),
            vmem_limit_bytes=_VMEM_LIMIT,
        ),
    )(gates, w_hh_p)

    # torch: cat per-batch (T, H) outputs along dim 0 -> (B*T, H) -> reshape(-1, B).
    # Kernel output is time-major (T, B, H); transpose to batch-major (same flat
    # element order as torch's concatenation) and reshape identically.
    res = jnp.transpose(out, (1, 0, 2)).reshape(-1, B)
    return res


def dynrnn_reference(x, w_ih, w_hh, bias):
    """Pure-JAX reference with PyTorch LSTM semantics (f32, highest precision)."""
    B, T, F = x.shape
    H = w_hh.shape[0]

    def cell(carry, x_t):
        h, c = carry
        g = (
            jnp.dot(x_t, w_ih, precision=lax.Precision.HIGHEST)
            + jnp.dot(h, w_hh, precision=lax.Precision.HIGHEST)
            + bias[0]
        )
        i_g = jax.nn.sigmoid(g[0 * H:1 * H])
        f_g = jax.nn.sigmoid(g[1 * H:2 * H])
        c_g = jnp.tanh(g[2 * H:3 * H])
        o_g = jax.nn.sigmoid(g[3 * H:4 * H])
        c_new = f_g * c + i_g * c_g
        h_new = o_g * jnp.tanh(c_new)
        return (h_new, c_new), h_new

    outs = []
    for b in range(B):
        _, hs = lax.scan(cell, (jnp.zeros((H,)), jnp.zeros((H,))), x[b])
        outs.append(hs)  # (T, H)
    return jnp.concatenate(outs, axis=0).reshape(-1, B)


def make_params(key, input_size, hidden_size, lookback=2):
    F = input_size * (1 + lookback)
    H = hidden_size
    k1, k2, k3 = jax.random.split(key, 3)
    scale = 1.0 / jnp.sqrt(H)
    # PyTorch LSTM stores (4H, F)/(4H, H); we pre-transpose for right-matmul.
    # Columns are in PyTorch gate order (i, f, g, o).
    w_ih = jax.random.uniform(k1, (F, 4 * H), jnp.float32, -scale, scale)
    w_hh = jax.random.uniform(k2, (H, 4 * H), jnp.float32, -scale, scale)
    bias = jax.random.uniform(k3, (1, 4 * H), jnp.float32, -scale, scale)
    return w_ih, w_hh, bias


if __name__ == "__main__":
    input_size = 4
    hidden_size = 32
    lookback = 2
    B, T = 2, 8
    F = input_size * (1 + lookback)  # 12

    key = jax.random.PRNGKey(0)
    kx, kp = jax.random.split(key)
    x = jax.random.normal(kx, (B, T, F), jnp.float32)
    w_ih, w_hh, bias = make_params(kp, input_size, hidden_size, lookback)

    res = dynrnn_forward(x, w_ih, w_hh, bias)
    jax.block_until_ready(res)
    assert res.shape == (T * hidden_size, B), res.shape

    # Sanity check against the pure-JAX reference (bf16 MXU operands -> loose tol).
    ref = dynrnn_reference(x, w_ih, w_hh, bias)
    assert jnp.allclose(res, ref, atol=5e-2, rtol=5e-2), float(
        jnp.max(jnp.abs(res - ref))
    )
    print("KERNEL_OK")
</pallas_src>

<mosaic_0001>
module attributes {stable_mosaic.version = 11 : i64} {
  func.func @_input_proj_kernel(%arg0: i32, %arg1: memref<16x12xbf16, #tpu.memory_space<vmem>>, %arg2: memref<12x128xbf16, #tpu.memory_space<vmem>>, %arg3: memref<1x128xf32, #tpu.memory_space<vmem>>, %arg4: memref<16x128xf32, #tpu.memory_space<vmem>>) attributes {dimension_semantics = [#tpu.dimension_semantics<parallel>], iteration_bounds = array<i64: 1>, scalar_prefetch = 0 : i64, scratch_operands = 0 : i64, tpu.core_type = #tpu.core_type<tc>, window_params = [{transform_indices = @transform_0, window_bounds = array<i64: 16, 12>}, {pipeline_mode = #tpu.pipeline_mode<synchronous>, transform_indices = @transform_1, window_bounds = array<i64: 12, 128>}, {pipeline_mode = #tpu.pipeline_mode<synchronous>, transform_indices = @transform_2, window_bounds = array<i64: 1, 128>}, {transform_indices = @transform_3, window_bounds = array<i64: 16, 128>}]} {
    %c0 = arith.constant 0 : index
    %c0_0 = arith.constant 0 : index
    %0 = vector.load %arg1[%c0, %c0_0] : memref<16x12xbf16, #tpu.memory_space<vmem>>, vector<16x12xbf16>
    %c0_1 = arith.constant 0 : index
    %c0_2 = arith.constant 0 : index
    %1 = vector.load %arg2[%c0_1, %c0_2] : memref<12x128xbf16, #tpu.memory_space<vmem>>, vector<12x128xbf16>
    %cst = arith.constant dense<0.000000e+00> : vector<16x128xf32>
    %2 = tpu.matmul %0, %1, %cst {dimension_numbers = #tpu.dot_dimension_numbers<[1], [0], [0], [1], [0, 0, 1, 1], [], []>} : vector<16x12xbf16>, vector<12x128xbf16>, vector<16x128xf32> -> vector<16x128xf32>
    %c0_3 = arith.constant 0 : index
    %c0_4 = arith.constant 0 : index
    %3 = vector.load %arg3[%c0_3, %c0_4] : memref<1x128xf32, #tpu.memory_space<vmem>>, vector<1x128xf32>
    %4 = vector.broadcast %3 : vector<1x128xf32> to vector<16x128xf32>
    %5 = arith.addf %2, %4 : vector<16x128xf32>
    %c0_5 = arith.constant 0 : index
    %c0_6 = arith.constant 0 : index
    %6 = vector.load %arg4[%c0_5, %c0_6] : memref<16x128xf32, #tpu.memory_space<vmem>>, vector<16x128xf32>
    tpu.vector_store %arg4[%c0_5, %c0_6], %5 {strides = array<i32>} : memref<16x128xf32, #tpu.memory_space<vmem>>, vector<16x128xf32>,
    return
  }
  func.func @transform_0(%arg0: i32) -> (i32, i32) {
    %c0_i32 = arith.constant 0 : i32
    %c0_i32_0 = arith.constant 0 : i32
    return %arg0, %c0_i32 : i32, i32
  }
  func.func @transform_1(%arg0: i32) -> (i32, i32) {
    %c0_i32 = arith.constant 0 : i32
    %c0_i32_0 = arith.constant 0 : i32
    %c0_i32_1 = arith.constant 0 : i32
    return %c0_i32, %c0_i32_0 : i32, i32
  }
  func.func @transform_2(%arg0: i32) -> (i32, i32) {
    %c0_i32 = arith.constant 0 : i32
    %c0_i32_0 = arith.constant 0 : i32
    %c0_i32_1 = arith.constant 0 : i32
    return %c0_i32, %c0_i32_0 : i32, i32
  }
  func.func @transform_3(%arg0: i32) -> (i32, i32) {
    %c0_i32 = arith.constant 0 : i32
    %c0_i32_0 = arith.constant 0 : i32
    return %arg0, %c0_i32 : i32, i32
  }
}

</mosaic_0001>

<bundles_post_ra>
// kernel: tpu_custom_call.1
= control target key start
LH: loop header
LB: loop body
LE: loop exit
PB: predicated region body
PF: predicated region fallthrough
CT: control target
= control target key end

     0   :  { %8 = vsyncpa [#allocation3], 0  ;;  %s297_s0 = inlined_call_operand.hbm [shape: bf16[16,12], index: 0, kind: input, shape index: {}]   ;;  %s298_s1 = inlined_call_operand.hbm [shape: bf16[12,128], index: 1, kind: input, shape index: {}]   ;;  %s299_s2 = inlined_call_operand.vmem [shape: f32[1,128], index: 2, kind: input, shape index: {}]   ;;  %s300_s3 = inlined_call_operand.hbm [shape: f32[16,128], index: 3, kind: output, shape index: {}]  }
   0x1   :  { %9 = vsyncpa [#allocation6], 0 }
   0x2   :  { %10 = vsyncpa [#allocation4], 0  ;;  %s229_s12 = smov [#allocation2]   ;;  %s157_s16 = scalar_lea.hbm %s297_s0, 128 }
   0x3   :  { %s16_s13 = sshll.u32 %s229_s12, 4  ;;  %p158_p0 = scmp.ne.s32.totalorder %s297_s0, %s157_s16  ;;  %s17_s13 = int_to_ptr.vmem [resolvable:$true] %s16_s13 }
   0x4   :  { %p161_p1 = scmp.lt.u32.totalorder %s157_s16, %s297_s0 }
   0x6   :  { %p163_p2 = pnand %p161_p1, %p158_p0 }
   0x8   :  { %166 = shalt.err (!%p163_p2)
}
   0x9   :  { %s167_s21 = scalar_lea.vmem %s17_s13, 128  ;;  %p172_p4 = scmp.lt.s32.totalorder %s17_s13, %s17_s13 }
   0xa   :  { %p168_p3 = scmp.ne.s32.totalorder %s17_s13, %s167_s21  ;;  %p173_p5 = scmp.lt.s32.totalorder %s167_s21, %s167_s21 }
   0xc   :  { %p174_p6 = por %p173_p5, %p172_p4 }
   0xe   :  { %p175_p7 = pnand %p174_p6, %p168_p3 }
  0x10   :  { %178 = shalt.err (!%p175_p7)
}
  0x11   :  { %s230_s22 = smov 64   ;;  %s231_s23 = smov 4  }
  0x12   :  { %22 = dma.hbm_to_vmem [thread:$0]  %s297_s0, 128, %s17_s13, [#allocation3], %s230_s22, %s230_s22, %s231_s23  }
  0x13   :  { %s232_s26 = smov [#allocation5]   ;;  %s179_s30 = scalar_lea.hbm %s298_s1, 128 }
  0x14   :  { %s28_s27 = sshll.u32 %s232_s26, 4  ;;  %p180_p8 = scmp.ne.s32.totalorder %s298_s1, %s179_s30  ;;  %s29_s27 = int_to_ptr.vmem [resolvable:$true] %s28_s27 }
  0x15   :  { %p183_p9 = scmp.lt.u32.totalorder %s179_s30, %s298_s1 }
  0x17   :  { %p185_p10 = pnand %p183_p9, %p180_p8 }
  0x19   :  { %188 = shalt.err (!%p185_p10)
}
  0x1a   :  { %s189_s8 = scalar_lea.vmem %s29_s27, 128  ;;  %p194_p12 = scmp.lt.s32.totalorder %s29_s27, %s29_s27 }
  0x1b   :  { %p190_p11 = scmp.ne.s32.totalorder %s29_s27, %s189_s8  ;;  %p195_p13 = scmp.lt.s32.totalorder %s189_s8, %s189_s8 }
  0x1d   :  { %p196_p0 = por %p195_p13, %p194_p12 }
  0x1f   :  { %p197_p1 = pnand %p196_p0, %p190_p11 }
  0x21   :  { %200 = shalt.err (!%p197_p1)
}
  0x22   :  { %34 = dma.hbm_to_vmem [thread:$0]  %s298_s1, 128, %s29_s27, [#allocation6], %s230_s22, %s230_s22, %s231_s23  }
  0x23   :  { %223 = dma.done.wait [#allocation3], 128  }
  0x24   :  { %224 = vsyncadd [#allocation3], 4294967168 }
  0x25   :  { %225 = dma.done.wait [#allocation6], 128  }
  0x26   :  { %226 = vsyncadd [#allocation6], 4294967168  ;;  %v233_v0 = vmov 0.0   ;;  %vm234_vm0 = vmmov 0   ;;  %vm69_vm1 = vcmask 1045504   ;;  %v156_v3 = vld [vmem:[#allocation2] sm:$0xff]  }
  0x27   :  { %140 = vmatprep.subr.bf16.mxu0 %v233_v0  ;;  %142 = vmatprep.mubr.msk.bf16.mxu0 %vm234_vm0, %v233_v0  ;;  %v155_v1 = vld [vmem:[#allocation5] sm:$0x3f]   ;;  %vm65_vm2 = vcmask 97280   ;;  %v134_v4 = vld [vmem:[%s299_s2] ss:$0 sm:$0xff]  ;;  %s235_s1 = smov [#allocation7]  }
  0x28   :  { %v71_v2 = vsel %vm69_vm1, %v155_v1, 0  ;;  %s121_s12 = sshll.u32 %s235_s1, 4  ;;  %s122_s12 = int_to_ptr.vmem [resolvable:$true] %s121_s12 }
  0x29   :  { %141 = vmatpush3.bf16.msra.mxu0 %v71_v2  ;;  %s201_s13 = scalar_lea.vmem %s122_s12, 256  ;;  %p206_p3 = scmp.lt.s32.totalorder %s122_s12, %s122_s12 }
  0x2a   :  { %p202_p2 = scmp.ne.s32.totalorder %s122_s12, %s201_s13  ;;  %p207_p4 = scmp.lt.s32.totalorder %s201_s13, %s201_s13 }
  0x2c   :  { %143 = vmatmul.mubr.msk.bf16.vlgmr.msra.gmra.mrb[0].mxu0 %vm65_vm2, %v156_v3  ;;  %p208_p5 = por %p207_p4, %p206_p3 }
  0x2e   :  { %p209_p6 = pnand %p208_p5, %p202_p2 }
  0xff   :  { %v107_v5 = vpop.f32.mrb[0].mxu0 }
 0x100   :  { %v108_v6 = vadd.f32 %v134_v4, %v107_v5  ;;  %v144_v7 = vpop.f32.mrb[1].mxu0 }
 0x101   :  { %v110_v8 = vpop.f32.mrb[2].mxu0 }
 0x102   :  { %114 = vst [vmem:[#allocation7] sm:$0xff] %v108_v6  ;;  %v111_v9 = vadd.f32 %v134_v4, %v110_v8  ;;  %v145_v10 = vpop.f32.mrb[3].mxu0 }
 0x104   :  { %115 = vst [vmem:[#allocation7 + $0x8] sm:$0xff] %v111_v9 }
 0x105   :  { %212 = shalt.err (!%p209_p6)
}
 0x106   :  { %s213_s15 = scalar_lea.hbm %s300_s3, 256 }
 0x107   :  { %p214_p7 = scmp.ne.s32.totalorder %s300_s3, %s213_s15  ;;  %p217_p8 = scmp.lt.u32.totalorder %s213_s15, %s300_s3 }
 0x109   :  { %p219_p9 = pnand %p217_p8, %p214_p7 }
 0x10b   :  { %222 = shalt.err (!%p219_p9)
}
 0x10c   :  { %s236_s20 = smov 128   ;;  %s237_s21 = smov 8  }
 0x10d   :  { %127 = dma.vmem_to_hbm [thread:$0]  %s122_s12, 256, %s300_s3, [#allocation4], %s236_s20, %s236_s20, %s237_s21  }
 0x10e   :  { %227 = dma.done.wait [#allocation4], 256  }
 0x10f   :  { %228 = vsyncadd [#allocation4], 4294967040 }
 0x110   :  { %131 = vsyncpa [#allocation3], 1 }
 0x111   :  { %132 = vsyncpa [#allocation6], 1 }
 0x112   :  { %133 = vsyncpa [#allocation4], 1 }

</bundles_post_ra>
